<compile_context>
chip_gen: v5e
topology: v5e:2x2
jax: 0.10.0
libtpu: 0.0.40
codegen_flags: <defaults>
</compile_context>

<pallas_src>
import math

import jax
import jax.numpy as jnp
from jax.experimental import pallas as pl
from jax.experimental.pallas import tpu as pltpu


def _proj_kernel(x_ref, w_ref, b_ref, o_ref, acc_ref):
    # x_ref: (tm, tk)  w_ref: (tk, tn)  b_ref: (1, tn)  o_ref: (tm, tn)
    # acc_ref: (tm, tn) f32 scratch, resident across the trailing K axis.
    k = pl.program_id(2)

    @pl.when(k == 0)
    def _init():
        acc_ref[...] = jnp.zeros_like(acc_ref)

    acc_ref[...] += jnp.dot(x_ref[...], w_ref[...],
                            preferred_element_type=jnp.float32)

    @pl.when(k == pl.num_programs(2) - 1)
    def _finalize():
        o_ref[...] = (acc_ref[...] + b_ref[...].astype(jnp.float32)
                      ).astype(o_ref.dtype)


def _fit_tile(dim, target, mult):
    """Pick a tile for `dim`: full extent if dim <= target (always legal),
    otherwise the largest multiple of `mult` <= target that divides `dim`
    (no padding needed), else `target` rounded down to `mult` (pad fallback)."""
    if dim <= target:
        return dim
    t = max(mult, (target // mult) * mult)
    for cand in range(t, mult - 1, -mult):
        if dim % cand == 0:
            return cand
    return t


def _pad_axis(a, axis, new_size):
    pad = new_size - a.shape[axis]
    if pad <= 0:
        return a
    widths = [(0, 0)] * a.ndim
    widths[axis] = (0, pad)
    return jnp.pad(a, widths)


def prepare_projection_weight(weight_hd):
    """One-time layout prep: nn.Linear weight (H, D) -> kernel-native (D, H).

    Do this once at parameter-load time so the hot forward path does not pay
    an extra full-weight HBM transpose on every call.
    """
    return jnp.asarray(weight_hd).T


def single_multihead_projection(x, w_dh, bias, num_heads, *,
                                tile_m=512, tile_n=512, tile_k=512):
    """x: (b, n, D), w_dh: (D, H) [kernel layout], bias: (H,) -> (b, n, h, d)."""
    b, n, D = x.shape
    Dw, H = w_dh.shape
    assert Dw == D, "weight must be in (D, H) layout (use prepare_projection_weight)"
    assert H % num_heads == 0
    head_dim = H // num_heads

    M = b * n
    x2d = x.reshape(M, D)
    b2d = bias.reshape(1, H)

    itemsize = jnp.dtype(x.dtype).itemsize
    # Minimum sublane multiple per dtype: 8 (f32), 16 (bf16), 32 (int8/fp8).
    row_mult = 8 * max(1, 4 // itemsize)

    tm = _fit_tile(M, tile_m, row_mult)
    tn = _fit_tile(H, tile_n, 128)
    tk = _fit_tile(D, tile_k, 128)

    gm, gn, gk = pl.cdiv(M, tm), pl.cdiv(H, tn), pl.cdiv(D, tk)
    M_pad, H_pad, D_pad = gm * tm, gn * tn, gk * tk

    # Padding is only a fallback for awkward shapes; common (128-multiple)
    # shapes take the zero-copy path because _fit_tile finds exact divisors.
    x2d = _pad_axis(_pad_axis(x2d, 0, M_pad), 1, D_pad)
    w = _pad_axis(_pad_axis(w_dh, 0, D_pad), 1, H_pad)
    b2d = _pad_axis(b2d, 1, H_pad)

    flops = 2 * M * D * H
    bytes_accessed = ((M_pad * D_pad + D_pad * H_pad + H_pad) * itemsize
                      + M_pad * H_pad * itemsize)

    # VMEM budget: double-buffered input tiles + double-buffered output tile
    # + f32 accumulator, with generous headroom. Clamped to stay within v5e's
    # small default and v7x's 64 MiB physical VMEM.
    vmem_est = (2 * (tm * tk + tk * tn + tn) * itemsize
                + 2 * tm * tn * itemsize
                + tm * tn * 4)
    vmem_limit = int(min(max(2 * vmem_est + (4 << 20), 16 << 20), 64 << 20))

    out2d = pl.pallas_call(
        _proj_kernel,
        out_shape=jax.ShapeDtypeStruct((M_pad, H_pad), x.dtype),
        grid_spec=pltpu.PrefetchScalarGridSpec(
            num_scalar_prefetch=0,
            grid=(gm, gn, gk),
            in_specs=[
                pl.BlockSpec((tm, tk), lambda i, j, k: (i, k)),   # activations
                pl.BlockSpec((tk, tn), lambda i, j, k: (k, j)),   # weight tile
                pl.BlockSpec((1, tn), lambda i, j, k: (0, j)),    # bias tile
            ],
            out_specs=pl.BlockSpec((tm, tn), lambda i, j, k: (i, j)),
            scratch_shapes=[pltpu.VMEM((tm, tn), jnp.float32)],
        ),
        compiler_params=pltpu.CompilerParams(
            dimension_semantics=("parallel", "parallel", "arbitrary"),
            vmem_limit_bytes=vmem_limit,
        ),
        cost_estimate=pl.CostEstimate(
            flops=flops, transcendentals=0, bytes_accessed=bytes_accessed),
    )(x2d, w, b2d)

    out2d = out2d[:M, :H]
    return out2d.reshape(b, n, num_heads, head_dim)


def init_linear_params(key, input_dim, hidden_dim, dtype=jnp.float32):
    """Deterministic init mirroring nn.Linear's kaiming-uniform-style bounds."""
    kw, kb = jax.random.split(key)
    bound = 1.0 / math.sqrt(input_dim)
    weight = jax.random.uniform(kw, (hidden_dim, input_dim), dtype,
                                minval=-bound, maxval=bound)
    bias = jax.random.uniform(kb, (hidden_dim,), dtype,
                              minval=-bound, maxval=bound)
    return weight, bias


if __name__ == "__main__":
    # Small shapes consistent with the module: (b, n, D) -> (b, n, h, d)
    batch, seq, input_dim = 2, 8, 16
    hidden_dim, num_heads = 32, 4

    key = jax.random.PRNGKey(0)
    kx, kp, kx2, kp2 = jax.random.split(key, 4)
    x = jax.random.normal(kx, (batch, seq, input_dim), jnp.float32)
    weight, bias = init_linear_params(kp, input_dim, hidden_dim)
    w_dh = prepare_projection_weight(weight)   # one-time (D, H) layout prep

    out = single_multihead_projection(x, w_dh, bias, num_heads)
    out = jax.block_until_ready(out)

    # Reference check in plain JAX (same math as nn.Linear + reshape).
    ref = (x.reshape(-1, input_dim) @ weight.T + bias).reshape(
        batch, seq, num_heads, hidden_dim // num_heads)
    assert out.shape == (batch, seq, num_heads, hidden_dim // num_heads)
    assert jnp.allclose(out, ref, atol=1e-5, rtol=1e-5)

    # Second check exercising the tiled (M, H, K) grid and the accumulator path.
    b2, n2, D2, H2, h2 = 2, 256, 256, 512, 8
    x_big = jax.random.normal(kx2, (b2, n2, D2), jnp.float32)
    w_big, bias_big = init_linear_params(kp2, D2, H2)
    out_big = single_multihead_projection(
        x_big, prepare_projection_weight(w_big), bias_big, h2,
        tile_m=128, tile_n=128, tile_k=128)
    out_big = jax.block_until_ready(out_big)
    ref_big = (x_big.reshape(-1, D2) @ w_big.T + bias_big).reshape(
        b2, n2, h2, H2 // h2)
    rel_err = jnp.max(jnp.abs(out_big - ref_big)) / jnp.max(jnp.abs(ref_big))
    assert out_big.shape == (b2, n2, h2, H2 // h2)
    assert float(rel_err) < 2e-2

    print("KERNEL_OK")
</pallas_src>

<mosaic_0001>
module attributes {stable_mosaic.version = 11 : i64} {
  func.func @_proj_kernel(%arg0: i32, %arg1: i32, %arg2: i32, %arg3: memref<16x16xf32, #tpu.memory_space<vmem>>, %arg4: memref<16x32xf32, #tpu.memory_space<vmem>>, %arg5: memref<1x32xf32, #tpu.memory_space<vmem>>, %arg6: memref<16x32xf32, #tpu.memory_space<vmem>>, %arg7: memref<16x32xf32, #tpu.memory_space<vmem>>) attributes {dimension_semantics = [#tpu.dimension_semantics<parallel>, #tpu.dimension_semantics<parallel>, #tpu.dimension_semantics<arbitrary>], iteration_bounds = array<i64: 1, 1, 1>, scalar_prefetch = 0 : i64, scratch_operands = 1 : i64, tpu.core_type = #tpu.core_type<tc>, window_params = [{transform_indices = @transform_0, window_bounds = array<i64: 16, 16>}, {transform_indices = @transform_1, window_bounds = array<i64: 16, 32>}, {transform_indices = @transform_2, window_bounds = array<i64: 1, 32>}, {transform_indices = @transform_3, window_bounds = array<i64: 16, 32>}]} {
    %c0_i32 = arith.constant 0 : i32
    %0 = arith.cmpi eq, %arg2, %c0_i32 : i32
    %1 = arith.extui %0 : i1 to i32
    %c0_i32_0 = arith.constant 0 : i32
    %2 = arith.cmpi ne, %1, %c0_i32_0 : i32
    scf.if %2 {
      %cst_10 = arith.constant 0.000000e+00 : f32
      %12 = vector.broadcast %cst_10 : f32 to vector<16x32xf32>
      %c0_11 = arith.constant 0 : index
      %c0_12 = arith.constant 0 : index
      %13 = vector.load %arg7[%c0_11, %c0_12] : memref<16x32xf32, #tpu.memory_space<vmem>>, vector<16x32xf32>
      tpu.vector_store %arg7[%c0_11, %c0_12], %12 {strides = array<i32>} : memref<16x32xf32, #tpu.memory_space<vmem>>, vector<16x32xf32>,
    } else {
    }
    %c0 = arith.constant 0 : index
    %c0_1 = arith.constant 0 : index
    %3 = vector.load %arg7[%c0, %c0_1] : memref<16x32xf32, #tpu.memory_space<vmem>>, vector<16x32xf32>
    %c0_2 = arith.constant 0 : index
    %c0_3 = arith.constant 0 : index
    %4 = vector.load %arg3[%c0_2, %c0_3] : memref<16x16xf32, #tpu.memory_space<vmem>>, vector<16x16xf32>
    %c0_4 = arith.constant 0 : index
    %c0_5 = arith.constant 0 : index
    %5 = vector.load %arg4[%c0_4, %c0_5] : memref<16x32xf32, #tpu.memory_space<vmem>>, vector<16x32xf32>
    %cst = arith.constant dense<0.000000e+00> : vector<16x32xf32>
    %6 = tpu.matmul %4, %5, %cst {dimension_numbers = #tpu.dot_dimension_numbers<[1], [0], [0], [1], [0, 0, 1, 1], [], []>} : vector<16x16xf32>, vector<16x32xf32>, vector<16x32xf32> -> vector<16x32xf32>
    %7 = arith.addf %3, %6 : vector<16x32xf32>
    %c0_6 = arith.constant 0 : index
    %c0_7 = arith.constant 0 : index
    %8 = vector.load %arg7[%c0_6, %c0_7] : memref<16x32xf32, #tpu.memory_space<vmem>>, vector<16x32xf32>
    tpu.vector_store %arg7[%c0_6, %c0_7], %7 {strides = array<i32>} : memref<16x32xf32, #tpu.memory_space<vmem>>, vector<16x32xf32>,
    %c0_i32_8 = arith.constant 0 : i32
    %9 = arith.cmpi eq, %arg2, %c0_i32_8 : i32
    %10 = arith.extui %9 : i1 to i32
    %c0_i32_9 = arith.constant 0 : i32
    %11 = arith.cmpi ne, %10, %c0_i32_9 : i32
    scf.if %11 {
      %c0_10 = arith.constant 0 : index
      %c0_11 = arith.constant 0 : index
      %12 = vector.load %arg7[%c0_10, %c0_11] : memref<16x32xf32, #tpu.memory_space<vmem>>, vector<16x32xf32>
      %c0_12 = arith.constant 0 : index
      %c0_13 = arith.constant 0 : index
      %13 = vector.load %arg5[%c0_12, %c0_13] : memref<1x32xf32, #tpu.memory_space<vmem>>, vector<1x32xf32>
      %14 = vector.broadcast %13 : vector<1x32xf32> to vector<16x32xf32>
      %15 = arith.addf %12, %14 : vector<16x32xf32>
      %c0_14 = arith.constant 0 : index
      %c0_15 = arith.constant 0 : index
      %16 = vector.load %arg6[%c0_14, %c0_15] : memref<16x32xf32, #tpu.memory_space<vmem>>, vector<16x32xf32>
      tpu.vector_store %arg6[%c0_14, %c0_15], %15 {strides = array<i32>} : memref<16x32xf32, #tpu.memory_space<vmem>>, vector<16x32xf32>,
    } else {
    }
    return
  }
  func.func @transform_0(%arg0: i32, %arg1: i32, %arg2: i32) -> (i32, i32) {
    %c0_i32 = arith.constant 0 : i32
    return %arg0, %arg2 : i32, i32
  }
  func.func @transform_1(%arg0: i32, %arg1: i32, %arg2: i32) -> (i32, i32) {
    %c0_i32 = arith.constant 0 : i32
    return %arg2, %arg1 : i32, i32
  }
  func.func @transform_2(%arg0: i32, %arg1: i32, %arg2: i32) -> (i32, i32) {
    %c0_i32 = arith.constant 0 : i32
    %c0_i32_0 = arith.constant 0 : i32
    return %c0_i32, %arg1 : i32, i32
  }
  func.func @transform_3(%arg0: i32, %arg1: i32, %arg2: i32) -> (i32, i32) {
    %c0_i32 = arith.constant 0 : i32
    return %arg0, %arg1 : i32, i32
  }
}

</mosaic_0001>

<bundles_post_ra>
// kernel: tpu_custom_call.1
= control target key start
LH: loop header
LB: loop body
LE: loop exit
PB: predicated region body
PF: predicated region fallthrough
CT: control target
= control target key end

     0   :  { %8 = vsyncpa [#allocation4], 0  ;;  %s270_s0 = inlined_call_operand.hbm [shape: f32[16,16], index: 0, kind: input, shape index: {}]   ;;  %s271_s1 = inlined_call_operand.hbm [shape: f32[16,32], index: 1, kind: input, shape index: {}]   ;;  %s272_s2 = inlined_call_operand.vmem [shape: f32[1,32], index: 2, kind: input, shape index: {}]   ;;  %s273_s3 = inlined_call_operand.hbm [shape: f32[16,32], index: 3, kind: output, shape index: {}]  }
   0x1   :  { %9 = vsyncpa [#allocation7], 0 }
   0x2   :  { %10 = vsyncpa [#allocation5], 0  ;;  %s15_s14 = sshll.u32 %s270_s0, 4  ;;  %s217_s15 = smov [#allocation3]   ;;  %s16_s14 = int_to_ptr.hbm [resolvable:$true] %s15_s14 }
   0x3   :  { %s17_s16 = sshll.u32 %s217_s15, 4  ;;  %s28_s19 = sshll.u32 %s271_s1, 4  ;;  %s18_s16 = int_to_ptr.vmem [resolvable:$true] %s17_s16  ;;  %s29_s19 = int_to_ptr.hbm [resolvable:$true] %s28_s19 }
   0x4   :  { %s218_s20 = smov 128   ;;  %s219_s21 = smov 8  }
   0x5   :  { %23 = dma.hbm_to_vmem [thread:$0]  %s16_s14, 256, %s18_s16, [#allocation4], %s218_s20, %s218_s20, %s219_s21  }
   0x6   :  { %s220_s22 = smov [#allocation6]  }
   0x7   :  { %s30_s23 = sshll.u32 %s220_s22, 4  ;;  %s31_s23 = int_to_ptr.vmem [resolvable:$true] %s30_s23 }
   0x8   :  { %36 = dma.hbm_to_vmem [thread:$0]  %s29_s19, 256, %s31_s23, [#allocation7], %s218_s20, %s218_s20, %s219_s21  }
   0x9   :  { %211 = dma.done.wait [#allocation4], 256  }
   0xa   :  { %212 = vsyncadd [#allocation4], 4294967040 }
   0xb   :  { %213 = dma.done.wait [#allocation7], 256  }
   0xc   :  { %214 = vsyncadd [#allocation7], 4294967040  ;;  %vm51_vm0 = vcmask 261120   ;;  %v221_v0 = vmov 0.0   ;;  %v59_v1 = vld [vmem:[#allocation6 + $0x8] sm:$0xff]  ;;  %v58_v2 = vld [vmem:[#allocation6] sm:$0xff] }
   0xd   :  { %52 = vst.msk [vmem:[#allocation2] sm:$0xff] %vm51_vm0, %v221_v0  ;;  %81 = vmatpush.msra.mxu0 %v59_v1  ;;  %130 = vmatpush.msra.mxu1 %v59_v1  ;;  %v56_v3 = vld [vmem:[#allocation3] sm:$0xff]  ;;  %vm60_vm1 = vcmask 130048   ;;  %v57_v4 = vld [vmem:[#allocation3 + $0x8] sm:$0xff]  ;;  %v138_v11 = vld [vmem:[%s272_s2] ss:$0 sm:$0xff] }
   0xe   :  { %53 = vst.msk [vmem:[#allocation2 + $0x8] sm:$0xff] %vm51_vm0, %v221_v0  ;;  %s222_s24 = smov [#allocation8]   ;;  %s114_s28 = sshll.u32 %s273_s3, 4  ;;  %s115_s28 = int_to_ptr.hbm [resolvable:$true] %s114_s28 }
   0xf   :  { %82 = vmatpush.msra.mxu0 %v58_v2  ;;  %131 = vmatpush.msra.mxu1 %v58_v2  ;;  %s112_s25 = sshll.u32 %s222_s24, 4  ;;  %s113_s25 = int_to_ptr.vmem [resolvable:$true] %s112_s25 }
  0x10   :  { %128 = vmatmul.msk.f32.vlgmr.msra.gmra.mxu0 %vm60_vm1, %v56_v3  ;;  %129 = vmatmul.msk.f32.vlgmr.msra.gmra.mxu1 %vm60_vm1, %v57_v4 }
  0x14   :  { %v54_v5 = vld [vmem:[#allocation2] sm:$0xff] }
  0x15   :  { %v55_v6 = vld [vmem:[#allocation2 + $0x8] sm:$0xff] }
  0x8d   :  { %v84_v7 = vpop.f32.mrf.mxu0  ;;  %v87_v8 = vpop.f32.mrf.mxu1 }
  0x8e   :  { %v90_v9 = vadd.f32 %v84_v7, %v54_v5  ;;  %v91_v10 = vadd.f32 %v87_v8, %v55_v6 }
  0x90   :  { %93 = vst.msk [vmem:[#allocation2] sm:$0xff] %vm51_vm0, %v90_v9 }
  0x91   :  { %94 = vst.msk [vmem:[#allocation2 + $0x8] sm:$0xff] %vm51_vm0, %v91_v10 }
  0x97   :  { %v98_v12 = vld [vmem:[#allocation2] sm:$0xff] }
  0x98   :  { %v99_v13 = vld [vmem:[#allocation2 + $0x8] sm:$0xff]  ;;  %v104_v14 = vadd.f32 %v138_v11, %v98_v12 }
  0x99   :  { %v105_v15 = vadd.f32 %v138_v11, %v99_v13 }
  0x9a   :  { %106 = vst.msk [vmem:[#allocation8] sm:$0xff] %vm51_vm0, %v104_v14 }
  0x9b   :  { %107 = vst.msk [vmem:[#allocation8 + $0x8] sm:$0xff] %vm51_vm0, %v105_v15 }
  0x9c   :  { %120 = dma.vmem_to_hbm [thread:$0]  %s113_s25, 256, %s115_s28, [#allocation5], %s218_s20, %s218_s20, %s219_s21  }
  0x9d   :  { %215 = dma.done.wait [#allocation5], 256  }
  0x9e   :  { %216 = vsyncadd [#allocation5], 4294967040 }
  0x9f   :  { %125 = vsyncpa [#allocation4], 1 }
  0xa0   :  { %126 = vsyncpa [#allocation7], 1 }
  0xa1   :  { %127 = vsyncpa [#allocation5], 1 }

</bundles_post_ra>
